<compile_context>
chip_gen: v7x
topology: tpu7x:2x2x1
jax: 0.10.0
libtpu: 0.0.40
codegen_flags: <defaults>
</compile_context>

<pallas_src>
import functools

import jax
import jax.numpy as jnp
from jax import lax
from jax.experimental import pallas as pl
from jax.experimental.pallas import tpu as pltpu


def _label_smoothing_ce_kernel(pred_ref, target_ref, loss_ref, *,
                               smoothing: float, n_valid: int):
    x = pred_ref[...].astype(jnp.float32)          # (TN, C), compute in f32
    t = target_ref[...]                            # (TN, 1) int32
    tn, c = x.shape

    # --- numerically stable logsumexp per row ---
    m = jnp.max(x, axis=1, keepdims=True)                          # (TN, 1)
    lse = jnp.log(jnp.sum(jnp.exp(x - m), axis=1, keepdims=True)) + m

    # --- fused weighted reduction (one pass over the class axis) ---
    #   loss_i = lse_i - sum_j w_ij * x_ij,  w = high at target, low elsewhere
    low = smoothing / (c - 1)
    high = 1.0 - smoothing
    cols = lax.broadcasted_iota(jnp.int32, (tn, c), 1)              # (TN, C)
    w = jnp.where(cols == t, high, low)                             # (TN, C)
    wx = jnp.sum(w * x, axis=1, keepdims=True)                      # (TN, 1)
    loss = lse - wx                                                 # (TN, 1)

    # --- mask padded rows so the wrapper can sum the whole output ---
    row0 = pl.program_id(0) * tn
    rows = row0 + lax.broadcasted_iota(jnp.int32, (tn, 1), 0)       # (TN, 1)
    loss_ref[...] = jnp.where(rows < n_valid, loss, 0.0)


def _choose_tile_rows(n: int, c: int, itemsize: int) -> int:
    # Working set per grid step (approx):
    #   2 * TN*C*itemsize  : double-buffered pred input block
    #   3 * TN*C*4         : in-kernel f32 temporaries (cast, exp, weighted)
    # Keep it <= ~36 MiB -> fits v7x's 64 MiB physical VMEM with headroom and
    # is well inside the 48 MiB scoped limit requested below.
    budget_bytes = 36 * 1024 * 1024
    per_row_bytes = c * (2 * itemsize + 12)
    budget_rows = max(8, budget_bytes // per_row_bytes)
    tn = min(2048, int(budget_rows))
    tn = max(8, (tn // 8) * 8)

    n_pad8 = ((n + 7) // 8) * 8
    if n_pad8 <= 8:
        return 8
    # Guarantee >= 2 grid blocks for non-trivial batches so the "parallel"
    # grid axis can shard across both v7x TensorCores, and never exceed the
    # (padded) batch.
    half = (((n_pad8 // 2) + 7) // 8) * 8
    return max(8, min(tn, half, n_pad8))


def label_smoothing_cross_entropy(pred: jax.Array,
                                  target: jax.Array,
                                  smoothing: float = 0.1,
                                  tile_rows: int | None = None) -> jax.Array:
    """pred: (N, C) float (f32 or bf16); target: (N,) int. Returns scalar f32 loss."""
    n, c = pred.shape
    if c < 2:
        raise ValueError("label smoothing requires at least 2 classes")
    low = smoothing / (c - 1)
    high = 1.0 - smoothing
    if low > high:
        # torch.clamp(min, max) with min > max behaves degenerately; reject.
        raise ValueError("smoothing too large: require smoothing <= (C-1)/C")

    itemsize = jnp.dtype(pred.dtype).itemsize
    if tile_rows is None:
        tn = _choose_tile_rows(n, c, itemsize)
    else:
        tn = max(8, (tile_rows // 8) * 8)
    n_blocks = pl.cdiv(n, tn)
    n_pad = n_blocks * tn

    target2d = target.astype(jnp.int32).reshape(n, 1)
    if n_pad != n:
        # Padded rows are computed but masked to zero inside the kernel.
        pred = jnp.pad(pred, ((0, n_pad - n), (0, 0)))
        target2d = jnp.pad(target2d, ((0, n_pad - n), (0, 0)))

    kernel = functools.partial(_label_smoothing_ce_kernel,
                               smoothing=float(smoothing), n_valid=n)

    bytes_accessed = int(n_pad * c * itemsize + n_pad * 4 + n_pad * 4)
    per_row = pl.pallas_call(
        kernel,
        out_shape=jax.ShapeDtypeStruct((n_pad, 1), jnp.float32),
        grid_spec=pltpu.PrefetchScalarGridSpec(
            num_scalar_prefetch=0,
            grid=(n_blocks,),
            in_specs=[
                pl.BlockSpec((tn, c), lambda i: (i, 0)),   # pred tile
                pl.BlockSpec((tn, 1), lambda i: (i, 0)),   # target tile
            ],
            out_specs=pl.BlockSpec((tn, 1), lambda i: (i, 0)),
        ),
        compiler_params=pltpu.CompilerParams(
            dimension_semantics=("parallel",),             # disjoint outputs -> both TCs on v7x
            vmem_limit_bytes=48 * 1024 * 1024,             # v7x-safe, >> v5e 16 MiB default
        ),
        cost_estimate=pl.CostEstimate(
            flops=6 * n_pad * c,
            transcendentals=n_pad * c,
            bytes_accessed=bytes_accessed,
        ),
    )(pred, target2d)

    # Padded rows are already zero; global mean over the true batch size.
    return jnp.sum(per_row) / n


def _reference(pred, target, smoothing=0.1):
    c = pred.shape[1]
    logp = jax.nn.log_softmax(pred.astype(jnp.float32), axis=1)
    onehot = jax.nn.one_hot(target, c, dtype=jnp.float32)
    onehot = jnp.clip(onehot, smoothing / (c - 1), 1.0 - smoothing)
    loss = -jnp.sum(onehot * logp, axis=1)
    return jnp.mean(loss)


if __name__ == "__main__":
    key = jax.random.PRNGKey(0)
    k1, k2, k3, k4, k5, k6, k7, k8 = jax.random.split(key, 8)

    # Case 1: small, tile-aligned batch (single block).
    N, C = 8, 32
    pred = jax.random.normal(k1, (N, C), dtype=jnp.float32)
    target = jax.random.randint(k2, (N,), 0, C, dtype=jnp.int32)
    loss = jax.block_until_ready(label_smoothing_cross_entropy(pred, target, 0.1))
    ref = _reference(pred, target, 0.1)
    assert jnp.allclose(loss, ref, atol=1e-5, rtol=1e-5), (loss, ref)

    # Case 2: ragged batch + non-128-multiple class axis (row padding + masking).
    N2, C2 = 10, 160
    pred2 = jax.random.normal(k3, (N2, C2), dtype=jnp.float32)
    target2 = jax.random.randint(k4, (N2,), 0, C2, dtype=jnp.int32)
    loss2 = jax.block_until_ready(label_smoothing_cross_entropy(pred2, target2, 0.1))
    ref2 = _reference(pred2, target2, 0.1)
    assert jnp.allclose(loss2, ref2, atol=1e-5, rtol=1e-5), (loss2, ref2)

    # Case 3: forced small tile -> multi-block pipelined grid, ragged last block.
    N3, C3 = 20, 32
    pred3 = jax.random.normal(k5, (N3, C3), dtype=jnp.float32)
    target3 = jax.random.randint(k6, (N3,), 0, C3, dtype=jnp.int32)
    loss3 = jax.block_until_ready(
        label_smoothing_cross_entropy(pred3, target3, 0.1, tile_rows=8))
    ref3 = _reference(pred3, target3, 0.1)
    assert jnp.allclose(loss3, ref3, atol=1e-5, rtol=1e-5), (loss3, ref3)

    # Case 4: bf16 logits (halves HBM bytes); auto tiling picks >=2 blocks.
    N4, C4 = 64, 226
    pred4 = jax.random.normal(k7, (N4, C4), dtype=jnp.float32).astype(jnp.bfloat16)
    target4 = jax.random.randint(k8, (N4,), 0, C4, dtype=jnp.int32)
    loss4 = jax.block_until_ready(label_smoothing_cross_entropy(pred4, target4, 0.1))
    ref4 = _reference(pred4, target4, 0.1)
    assert jnp.allclose(loss4, ref4, atol=1e-5, rtol=1e-5), (loss4, ref4)

    # TODO(synk): for LM-sized vocabularies (C >> 32K) add a second grid axis
    # over classes with online-logsumexp accumulators; not needed for this module.
    print("KERNEL_OK")
</pallas_src>

<mosaic_0001>
module attributes {stable_mosaic.version = 11 : i64} {
  func.func @_label_smoothing_ce_kernel(%arg0: i32, %arg1: memref<8x32xf32, #tpu.memory_space<vmem>>, %arg2: memref<8x1xi32, #tpu.memory_space<vmem>>, %arg3: memref<8x1xf32, #tpu.memory_space<vmem>>) attributes {dimension_semantics = [#tpu.dimension_semantics<parallel>], iteration_bounds = array<i64: 1>, scalar_prefetch = 0 : i64, scratch_operands = 0 : i64, tpu.core_type = #tpu.core_type<tc>, window_params = [{transform_indices = @transform_0, window_bounds = array<i64: 8, 32>}, {transform_indices = @transform_1, window_bounds = array<i64: 8, 1>}, {transform_indices = @transform_2, window_bounds = array<i64: 8, 1>}]} {
    %c0 = arith.constant 0 : index
    %c0_0 = arith.constant 0 : index
    %0 = vector.load %arg1[%c0, %c0_0] : memref<8x32xf32, #tpu.memory_space<vmem>>, vector<8x32xf32>
    %c0_1 = arith.constant 0 : index
    %c0_2 = arith.constant 0 : index
    %1 = vector.load %arg2[%c0_1, %c0_2] : memref<8x1xi32, #tpu.memory_space<vmem>>, vector<8x1xi32>
    %cst = arith.constant dense<0xFF800000> : vector<8xf32>
    %2 = vector.multi_reduction <maximumf>, %0, %cst [1] : vector<8x32xf32> to vector<8xf32>
    %3 = vector.shape_cast %2 : vector<8xf32> to vector<8x1xf32>
    %4 = vector.broadcast %3 : vector<8x1xf32> to vector<8x32xf32>
    %5 = arith.subf %0, %4 : vector<8x32xf32>
    %6 = math.exp %5 : vector<8x32xf32>
    %cst_3 = arith.constant dense<0.000000e+00> : vector<8xf32>
    %7 = vector.multi_reduction <add>, %6, %cst_3 [1] : vector<8x32xf32> to vector<8xf32>
    %8 = vector.shape_cast %7 : vector<8xf32> to vector<8x1xf32>
    %9 = math.log %8 : vector<8x1xf32>
    %10 = arith.addf %9, %3 : vector<8x1xf32>
    %11 = tpu.iota {dimensions = array<i32: 1>} : vector<8x32xi32>
    %12 = vector.broadcast %1 : vector<8x1xi32> to vector<8x32xi32>
    %13 = arith.cmpi eq, %11, %12 : vector<8x32xi32>
    %cst_4 = arith.constant 0.899999976 : f32
    %cst_5 = arith.constant 0.0032258064 : f32
    %14 = vector.broadcast %cst_4 : f32 to vector<8x32xf32>
    %15 = vector.broadcast %cst_5 : f32 to vector<8x32xf32>
    %16 = arith.select %13, %14, %15 : vector<8x32xi1>, vector<8x32xf32>
    %17 = arith.mulf %16, %0 : vector<8x32xf32>
    %cst_6 = arith.constant dense<0.000000e+00> : vector<8xf32>
    %18 = vector.multi_reduction <add>, %17, %cst_6 [1] : vector<8x32xf32> to vector<8xf32>
    %19 = vector.shape_cast %18 : vector<8xf32> to vector<8x1xf32>
    %20 = arith.subf %10, %19 : vector<8x1xf32>
    %c8_i32 = arith.constant 8 : i32
    %21 = arith.muli %arg0, %c8_i32 : i32
    %22 = tpu.iota {dimensions = array<i32: 0>} : vector<8x1xi32>
    %23 = vector.broadcast %21 : i32 to vector<8x1xi32>
    %24 = arith.addi %23, %22 : vector<8x1xi32>
    %c8_i32_7 = arith.constant 8 : i32
    %25 = vector.broadcast %c8_i32_7 : i32 to vector<8x1xi32>
    %26 = arith.cmpi slt, %24, %25 : vector<8x1xi32>
    %cst_8 = arith.constant 0.000000e+00 : f32
    %27 = vector.broadcast %cst_8 : f32 to vector<8x1xf32>
    %28 = arith.select %26, %20, %27 : vector<8x1xi1>, vector<8x1xf32>
    %c0_9 = arith.constant 0 : index
    %c0_10 = arith.constant 0 : index
    %29 = vector.load %arg3[%c0_9, %c0_10] : memref<8x1xf32, #tpu.memory_space<vmem>>, vector<8x1xf32>
    tpu.vector_store %arg3[%c0_9, %c0_10], %28 {strides = array<i32>} : memref<8x1xf32, #tpu.memory_space<vmem>>, vector<8x1xf32>,
    return
  }
  func.func @transform_0(%arg0: i32) -> (i32, i32) {
    %c0_i32 = arith.constant 0 : i32
    %c0_i32_0 = arith.constant 0 : i32
    return %arg0, %c0_i32 : i32, i32
  }
  func.func @transform_1(%arg0: i32) -> (i32, i32) {
    %c0_i32 = arith.constant 0 : i32
    %c0_i32_0 = arith.constant 0 : i32
    return %arg0, %c0_i32 : i32, i32
  }
  func.func @transform_2(%arg0: i32) -> (i32, i32) {
    %c0_i32 = arith.constant 0 : i32
    %c0_i32_0 = arith.constant 0 : i32
    return %arg0, %c0_i32 : i32, i32
  }
}

</mosaic_0001>

<bundles_post_ra>
// kernel: tpu_custom_call.1
= control target key start
LH: loop header
LB: loop body
LE: loop exit
PB: predicated region body
PF: predicated region fallthrough
CT: control target
= control target key end

     0   :  { %vm13_vm0 = vcmask 261120   ;;  %v58_v1 = vmov 0   ;;  %v26_v6 = vlaneseq  ;;  %v59_v10 = vmov 0.0032258064   ;;  %s87_s0 = inlined_call_operand.vmem [shape: f32[8,32], index: 0, kind: input, shape index: {}]   ;;  %s88_s1 = inlined_call_operand.vmem [shape: s32[8,1], index: 1, kind: input, shape index: {}]   ;;  %s89_s2 = inlined_call_operand.vmem [shape: f32[8,1], index: 2, kind: output, shape index: {}]  }
   0x1   :  { %v11_v0 = vld [vmem:[%s87_s0] sm:$0xff]  ;;  %53 = vset.pattern.permute.xlu0 %v58_v1  ;;  %vm45_vm2 = vcmask 7168  }
   0x2   :  { %v14_v2 = vsel %vm13_vm0, %v11_v0, -inf  ;;  %v12_v3 = vld [vmem:[%s88_s1] sm:$0xff]  ;;  %v27_v8 = vand.u32 127, %v26_v6 }
   0x3   :  { %15 = vmax.xlane.f32.xlu0 %v14_v2 }
  0x19   :  { %29 = vperm.xlu0 %53, %v12_v3  }
  0x90   :  { %v16_v4 = vpop.xlane.xlu0 %15 }
  0x91   :  { %v17_v5 = vsub.f32 %v11_v0, %v16_v4 }
  0x93   :  { %v18_v7 = vmul.f32 1.442695, %v17_v5 }
  0x95   :  { %54 = vpow2.f32 %v18_v7 }
  0x98   :  { %v30_v9 = vpop.permute.xlu0 %29 }
  0x99   :  { %vm31_vm1 = vcmp.eq.s32.totalorder %v27_v8, %v30_v9 }
  0x9a   :  { %v32_v11 = vsel %vm31_vm1, 0.9, %v59_v10 }
  0x9b   :  { %v33_v12 = vmul.f32 %v32_v11, %v11_v0 }
  0x9d   :  { %v34_v15 = vsel %vm13_vm0, %v33_v12, 0.0 }
  0x9f   :  { %v55_v13 = vpop.eup %54 }
  0xa0   :  { %v20_v14 = vsel %vm13_vm0, %v55_v13, 0.0 }
  0xa1   :  { %21 = vadd.xlane.f32.xlu1 %v20_v14 }
  0xa5   :  { %35 = vadd.xlane.f32.xlu1 %v34_v15 }
 0x12e   :  { %v22_v16 = vpop.xlane.xlu1 %21 }
 0x12f   :  { %56 = vlog2.f32 %v22_v16 }
 0x132   :  { %v36_v19 = vpop.xlane.xlu1 %35 }
 0x139   :  { %v57_v17 = vpop.eup %56 }
 0x13a   :  { %v24_v18 = vmul.f32 0.6931472, %v57_v17 }
 0x13c   :  { %v25_v20 = vadd.f32 %v24_v18, %v16_v4 }
 0x13e   :  { %v37_v21 = vsub.f32 %v25_v20, %v36_v19 }
 0x140   :  { %46 = vst.msk [vmem:[%s89_s2] sm:$0xff] %vm45_vm2, %v37_v21 }

</bundles_post_ra>
